<compile_context>
chip_gen: v5e
topology: v5e:2x2
jax: 0.10.0
libtpu: 0.0.40
codegen_flags: <defaults>
</compile_context>

<pallas_src>
import functools

import jax
import jax.numpy as jnp
from jax.experimental import pallas as pl
from jax.experimental.pallas import tpu as pltpu

_LANE = 128


def _focal_row(x, t, a_col, *, gamma, use_alpha):
    """Focal loss for one [C, T] tile (classes on sublanes, batch on lanes).

    Returns a lane-dense [1, T] row. Columns whose target column is all zeros
    (batch padding) produce exactly 0.
    """
    # --- log-softmax pieces over the class (sublane) axis ---
    m = jnp.max(x, axis=0, keepdims=True)                       # [1, T]
    z = x - m                                                   # [C, T]
    lse = jnp.log(jnp.sum(jnp.exp(z), axis=0, keepdims=True))   # [1, T]
    # ce = -sum_c t*(z - lse) = lse*sum(t) - sum(t*z); exact for any targets
    # (no normalization assumption) and avoids a full [C, T] log-prob temp.
    t_sum = jnp.sum(t, axis=0, keepdims=True)                   # [1, T]
    tz = jnp.sum(t * z, axis=0, keepdims=True)                  # [1, T]
    ce = lse * t_sum - tz                                       # [1, T]

    # --- focal modulation ---
    p_t = jnp.exp(-ce)
    q = 1.0 - p_t
    g = float(gamma)
    if g.is_integer() and 0.0 <= g <= 16.0:
        gi = int(g)
        if gi == 0:
            mod = jnp.ones_like(q)
        else:
            mod = q
            for _ in range(gi - 1):          # cheap VPU multiplies
                mod = mod * q
    else:
        # clamp guards NaN from pow() when rounding makes q slightly negative
        mod = jnp.power(jnp.maximum(q, 0.0), jnp.float32(g))
    focal = mod * ce                                            # [1, T]

    # --- alpha[argmax(targets, class axis)], torch first-max tie-break ---
    if use_alpha:
        c = t.shape[0]
        row = jax.lax.broadcasted_iota(jnp.int32, t.shape, 0)   # [C, T]
        tmax = jnp.max(t, axis=0, keepdims=True)                # [1, T]
        is_max = t >= tmax
        idx = jnp.min(jnp.where(is_max, row, c), axis=0, keepdims=True)  # [1, T]
        alpha_t = jnp.sum(jnp.where(row == idx, a_col, 0.0),
                          axis=0, keepdims=True)                # [1, T]
        focal = focal * alpha_t
    return focal


def _focal_none_kernel(logits_ref, targets_ref, alpha_ref, out_ref, *,
                       gamma, use_alpha):
    focal = _focal_row(logits_ref[...].astype(jnp.float32),
                       targets_ref[...].astype(jnp.float32),
                       alpha_ref[...], gamma=gamma, use_alpha=use_alpha)
    out_ref[...] = focal                                        # [1, TILE_N]


def _focal_reduce_kernel(logits_ref, targets_ref, alpha_ref, out_ref, acc_ref, *,
                         gamma, use_alpha, reduction, n_rows):
    i = pl.program_id(0)

    @pl.when(i == 0)
    def _():
        acc_ref[...] = jnp.zeros_like(acc_ref)

    focal = _focal_row(logits_ref[...].astype(jnp.float32),
                       targets_ref[...].astype(jnp.float32),
                       alpha_ref[...], gamma=gamma, use_alpha=use_alpha)
    acc_ref[...] += focal                                       # [1, TILE_N]

    @pl.when(i == pl.num_programs(0) - 1)
    def _():
        total = jnp.sum(acc_ref[...], axis=-1, keepdims=True)   # [1, 1]
        if reduction == "mean":
            total = total / jnp.float32(n_rows)
        out_ref[...] = total


def focal_loss(inputs, targets, alpha=None, gamma=2.0, reduction="mean",
               tile_n=1024):
    """inputs, targets: [N, C] float arrays. alpha: optional [C] float array."""
    n, c = inputs.shape
    use_alpha = alpha is not None
    if alpha is None:
        alpha_col = jnp.ones((c, 1), dtype=jnp.float32)
    else:
        alpha_col = jnp.asarray(alpha, dtype=jnp.float32).reshape(c, 1)

    # Batch on the lane axis: [C, N_pad] with N padded to a multiple of the
    # tile size (zero-padded columns contribute exactly 0 to the loss).
    tile_n = ((int(tile_n) + _LANE - 1) // _LANE) * _LANE
    tile_n = max(_LANE, min(tile_n, ((n + _LANE - 1) // _LANE) * _LANE))
    n_pad = ((n + tile_n - 1) // tile_n) * tile_n
    grid = (n_pad // tile_n,)

    x_t = jnp.pad(jnp.transpose(inputs), ((0, 0), (0, n_pad - n)))
    t_t = jnp.pad(jnp.transpose(targets), ((0, 0), (0, n_pad - n)))

    in_specs = [
        pl.BlockSpec((c, tile_n), lambda i: (0, i)),   # logits  [C, N_pad]
        pl.BlockSpec((c, tile_n), lambda i: (0, i)),   # targets [C, N_pad]
        pl.BlockSpec((c, 1), lambda i: (0, 0)),        # alpha   [C, 1]
    ]

    # VMEM budget: 2 inputs x 2 pipeline buffers x (sublane-padded tile) plus
    # accumulator/alpha/output. Sized explicitly so it fits v5e's 16 MiB and
    # v7x's 32 MiB scoped defaults with large headroom.
    sublane_c = ((c + 7) // 8) * 8
    tile_bytes = sublane_c * tile_n * 4
    vmem_limit = max(4 * tile_bytes + (2 << 20), 4 << 20)

    cost = pl.CostEstimate(
        flops=10 * n_pad * c,
        transcendentals=n_pad * (c + 2),
        bytes_accessed=2 * n_pad * c * inputs.dtype.itemsize + 4 * n_pad,
    )

    if reduction in ("mean", "sum"):
        # TODO(synk): on v7x, split the batch grid into two core-parallel
        # halves producing partial sums combined outside the kernel.
        kernel = functools.partial(_focal_reduce_kernel, gamma=float(gamma),
                                   use_alpha=use_alpha, reduction=reduction,
                                   n_rows=n)
        out = pl.pallas_call(
            kernel,
            out_shape=jax.ShapeDtypeStruct((1, 1), jnp.float32),
            grid=grid,
            in_specs=in_specs,
            out_specs=pl.BlockSpec((1, 1), lambda i: (0, 0)),
            scratch_shapes=[pltpu.VMEM((1, tile_n), jnp.float32)],
            compiler_params=pltpu.CompilerParams(
                dimension_semantics=("arbitrary",),
                vmem_limit_bytes=vmem_limit),
            cost_estimate=cost,
        )(x_t, t_t, alpha_col)
        return out[0, 0]

    # reduction == 'none': lane-dense [1, N_pad] output, sliced back to [N].
    kernel = functools.partial(_focal_none_kernel, gamma=float(gamma),
                               use_alpha=use_alpha)
    out = pl.pallas_call(
        kernel,
        out_shape=jax.ShapeDtypeStruct((1, n_pad), jnp.float32),
        grid=grid,
        in_specs=in_specs,
        out_specs=pl.BlockSpec((1, tile_n), lambda i: (0, i)),
        compiler_params=pltpu.CompilerParams(
            dimension_semantics=("parallel",),
            vmem_limit_bytes=vmem_limit),
        cost_estimate=cost,
    )(x_t, t_t, alpha_col)
    return out[0, :n]


def _focal_loss_ref(inputs, targets, alpha, gamma, reduction):
    logp = jax.nn.log_softmax(inputs.astype(jnp.float32), axis=-1)
    ce = -jnp.sum(targets.astype(jnp.float32) * logp, axis=-1)
    p_t = jnp.exp(-ce)
    fl = (1.0 - p_t) ** gamma * ce
    if alpha is not None:
        fl = fl * alpha[jnp.argmax(targets, axis=1)]
    if reduction == "mean":
        return fl.mean()
    if reduction == "sum":
        return fl.sum()
    return fl


if __name__ == "__main__":
    key = jax.random.PRNGKey(0)
    k1, k2, k3, k4 = jax.random.split(key, 4)

    C = 10
    gamma = 2.0
    alpha = jnp.linspace(0.5, 1.5, C, dtype=jnp.float32)

    # Case 1: small batch (N=64 -> padded to one 128-lane tile), mean.
    N1 = 64
    logits1 = jax.random.normal(k1, (N1, C), dtype=jnp.float32)
    targets1 = jax.nn.one_hot(jax.random.randint(k2, (N1,), 0, C), C,
                              dtype=jnp.float32)

    out_mean = jax.block_until_ready(
        focal_loss(logits1, targets1, alpha=alpha, gamma=gamma, reduction="mean"))
    ref_mean = _focal_loss_ref(logits1, targets1, alpha, gamma, "mean")
    assert jnp.allclose(out_mean, ref_mean, rtol=1e-5, atol=1e-5), (out_mean, ref_mean)

    out_na = jax.block_until_ready(
        focal_loss(logits1, targets1, alpha=None, gamma=gamma, reduction="mean"))
    ref_na = _focal_loss_ref(logits1, targets1, None, gamma, "mean")
    assert jnp.allclose(out_na, ref_na, rtol=1e-5, atol=1e-5), (out_na, ref_na)

    # Case 2: multi-tile batch (N=300 -> 3 tiles of 128 lanes), sum + none.
    N2 = 300
    logits2 = jax.random.normal(k3, (N2, C), dtype=jnp.float32)
    targets2 = jax.nn.one_hot(jax.random.randint(k4, (N2,), 0, C), C,
                              dtype=jnp.float32)

    out_sum = jax.block_until_ready(
        focal_loss(logits2, targets2, alpha=alpha, gamma=gamma, reduction="sum",
                   tile_n=128))
    ref_sum = _focal_loss_ref(logits2, targets2, alpha, gamma, "sum")
    assert jnp.allclose(out_sum, ref_sum, rtol=1e-4, atol=1e-4), (out_sum, ref_sum)

    out_none = jax.block_until_ready(
        focal_loss(logits2, targets2, alpha=alpha, gamma=gamma, reduction="none",
                   tile_n=128))
    ref_none = _focal_loss_ref(logits2, targets2, alpha, gamma, "none")
    assert jnp.allclose(out_none, ref_none, rtol=1e-5, atol=1e-5), "none mismatch"

    print("KERNEL_OK")
</pallas_src>

<mosaic_0001>
module attributes {stable_mosaic.version = 11 : i64} {
  func.func @_focal_reduce_kernel(%arg0: i32, %arg1: memref<10x128xf32, #tpu.memory_space<vmem>>, %arg2: memref<10x128xf32, #tpu.memory_space<vmem>>, %arg3: memref<10x1xf32, #tpu.memory_space<vmem>>, %arg4: memref<1x1xf32, #tpu.memory_space<vmem>>, %arg5: memref<1x128xf32, #tpu.memory_space<vmem>>) attributes {dimension_semantics = [#tpu.dimension_semantics<arbitrary>], iteration_bounds = array<i64: 1>, scalar_prefetch = 0 : i64, scratch_operands = 1 : i64, tpu.core_type = #tpu.core_type<tc>, window_params = [{transform_indices = @transform_0, window_bounds = array<i64: 10, 128>}, {transform_indices = @transform_1, window_bounds = array<i64: 10, 128>}, {pipeline_mode = #tpu.pipeline_mode<synchronous>, transform_indices = @transform_2, window_bounds = array<i64: 10, 1>}, {pipeline_mode = #tpu.pipeline_mode<synchronous>, transform_indices = @transform_3, window_bounds = array<i64: 1, 1>}]} {
    %c0_i32 = arith.constant 0 : i32
    %0 = arith.cmpi eq, %arg0, %c0_i32 : i32
    %1 = arith.extui %0 : i1 to i32
    %c0_i32_0 = arith.constant 0 : i32
    %2 = arith.cmpi ne, %1, %c0_i32_0 : i32
    scf.if %2 {
      %cst_21 = arith.constant 0.000000e+00 : f32
      %52 = vector.broadcast %cst_21 : f32 to vector<1x128xf32>
      %c0_22 = arith.constant 0 : index
      %c0_23 = arith.constant 0 : index
      %53 = vector.load %arg5[%c0_22, %c0_23] : memref<1x128xf32, #tpu.memory_space<vmem>>, vector<1x128xf32>
      tpu.vector_store %arg5[%c0_22, %c0_23], %52 {strides = array<i32>} : memref<1x128xf32, #tpu.memory_space<vmem>>, vector<1x128xf32>,
    } else {
    }
    %c0 = arith.constant 0 : index
    %c0_1 = arith.constant 0 : index
    %3 = vector.load %arg1[%c0, %c0_1] : memref<10x128xf32, #tpu.memory_space<vmem>>, vector<10x128xf32>
    %c0_2 = arith.constant 0 : index
    %c0_3 = arith.constant 0 : index
    %4 = vector.load %arg2[%c0_2, %c0_3] : memref<10x128xf32, #tpu.memory_space<vmem>>, vector<10x128xf32>
    %c0_4 = arith.constant 0 : index
    %c0_5 = arith.constant 0 : index
    %5 = vector.load %arg3[%c0_4, %c0_5] : memref<10x1xf32, #tpu.memory_space<vmem>>, vector<10x1xf32>
    %cst = arith.constant dense<0xFF800000> : vector<128xf32>
    %6 = vector.multi_reduction <maximumf>, %3, %cst [0] : vector<10x128xf32> to vector<128xf32>
    %7 = vector.shape_cast %6 : vector<128xf32> to vector<1x128xf32>
    %8 = vector.broadcast %7 : vector<1x128xf32> to vector<10x128xf32>
    %9 = arith.subf %3, %8 : vector<10x128xf32>
    %10 = math.exp %9 : vector<10x128xf32>
    %cst_6 = arith.constant dense<0.000000e+00> : vector<128xf32>
    %11 = vector.multi_reduction <add>, %10, %cst_6 [0] : vector<10x128xf32> to vector<128xf32>
    %12 = vector.shape_cast %11 : vector<128xf32> to vector<1x128xf32>
    %13 = math.log %12 : vector<1x128xf32>
    %cst_7 = arith.constant dense<0.000000e+00> : vector<128xf32>
    %14 = vector.multi_reduction <add>, %4, %cst_7 [0] : vector<10x128xf32> to vector<128xf32>
    %15 = vector.shape_cast %14 : vector<128xf32> to vector<1x128xf32>
    %16 = arith.mulf %4, %9 : vector<10x128xf32>
    %cst_8 = arith.constant dense<0.000000e+00> : vector<128xf32>
    %17 = vector.multi_reduction <add>, %16, %cst_8 [0] : vector<10x128xf32> to vector<128xf32>
    %18 = vector.shape_cast %17 : vector<128xf32> to vector<1x128xf32>
    %19 = arith.mulf %13, %15 : vector<1x128xf32>
    %20 = arith.subf %19, %18 : vector<1x128xf32>
    %cst_9 = arith.constant 0.000000e+00 : f32
    %21 = vector.broadcast %cst_9 : f32 to vector<1x128xf32>
    %22 = arith.subf %21, %20 : vector<1x128xf32>
    %23 = math.exp %22 : vector<1x128xf32>
    %cst_10 = arith.constant 1.000000e+00 : f32
    %24 = vector.broadcast %cst_10 : f32 to vector<1x128xf32>
    %25 = arith.subf %24, %23 : vector<1x128xf32>
    %26 = arith.mulf %25, %25 : vector<1x128xf32>
    %27 = arith.mulf %26, %20 : vector<1x128xf32>
    %28 = tpu.iota {dimensions = array<i32: 0>} : vector<10x128xi32>
    %cst_11 = arith.constant dense<0xFF800000> : vector<128xf32>
    %29 = vector.multi_reduction <maximumf>, %4, %cst_11 [0] : vector<10x128xf32> to vector<128xf32>
    %30 = vector.shape_cast %29 : vector<128xf32> to vector<1x128xf32>
    %31 = vector.broadcast %30 : vector<1x128xf32> to vector<10x128xf32>
    %32 = arith.cmpf oge, %4, %31 : vector<10x128xf32>
    %c10_i32 = arith.constant 10 : i32
    %33 = vector.broadcast %c10_i32 : i32 to vector<10x128xi32>
    %34 = arith.select %32, %28, %33 : vector<10x128xi1>, vector<10x128xi32>
    %cst_12 = arith.constant dense<2147483647> : vector<128xi32>
    %35 = vector.multi_reduction <minsi>, %34, %cst_12 [0] : vector<10x128xi32> to vector<128xi32>
    %36 = vector.shape_cast %35 : vector<128xi32> to vector<1x128xi32>
    %37 = vector.broadcast %36 : vector<1x128xi32> to vector<10x128xi32>
    %38 = arith.cmpi eq, %28, %37 : vector<10x128xi32>
    %cst_13 = arith.constant 0.000000e+00 : f32
    %39 = vector.shape_cast %5 : vector<10x1xf32> to vector<10x1xf32>
    %40 = vector.broadcast %39 : vector<10x1xf32> to vector<10x128xf32>
    %41 = vector.broadcast %cst_13 : f32 to vector<10x128xf32>
    %42 = arith.select %38, %40, %41 : vector<10x128xi1>, vector<10x128xf32>
    %cst_14 = arith.constant dense<0.000000e+00> : vector<128xf32>
    %43 = vector.multi_reduction <add>, %42, %cst_14 [0] : vector<10x128xf32> to vector<128xf32>
    %44 = vector.shape_cast %43 : vector<128xf32> to vector<1x128xf32>
    %45 = arith.mulf %27, %44 : vector<1x128xf32>
    %c0_15 = arith.constant 0 : index
    %c0_16 = arith.constant 0 : index
    %46 = vector.load %arg5[%c0_15, %c0_16] : memref<1x128xf32, #tpu.memory_space<vmem>>, vector<1x128xf32>
    %47 = arith.addf %46, %45 : vector<1x128xf32>
    %c0_17 = arith.constant 0 : index
    %c0_18 = arith.constant 0 : index
    %48 = vector.load %arg5[%c0_17, %c0_18] : memref<1x128xf32, #tpu.memory_space<vmem>>, vector<1x128xf32>
    tpu.vector_store %arg5[%c0_17, %c0_18], %47 {strides = array<i32>} : memref<1x128xf32, #tpu.memory_space<vmem>>, vector<1x128xf32>,
    %c0_i32_19 = arith.constant 0 : i32
    %49 = arith.cmpi eq, %arg0, %c0_i32_19 : i32
    %50 = arith.extui %49 : i1 to i32
    %c0_i32_20 = arith.constant 0 : i32
    %51 = arith.cmpi ne, %50, %c0_i32_20 : i32
    scf.if %51 {
      %c0_21 = arith.constant 0 : index
      %c0_22 = arith.constant 0 : index
      %52 = vector.load %arg5[%c0_21, %c0_22] : memref<1x128xf32, #tpu.memory_space<vmem>>, vector<1x128xf32>
      %cst_23 = arith.constant dense<0.000000e+00> : vector<1xf32>
      %53 = vector.multi_reduction <add>, %52, %cst_23 [1] : vector<1x128xf32> to vector<1xf32>
      %54 = vector.shape_cast %53 : vector<1xf32> to vector<1x1xf32>
      %cst_24 = arith.constant 6.400000e+01 : f32
      %55 = vector.broadcast %cst_24 : f32 to vector<1x1xf32>
      %56 = arith.divf %54, %55 : vector<1x1xf32>
      %c0_25 = arith.constant 0 : index
      %c0_26 = arith.constant 0 : index
      %57 = vector.load %arg4[%c0_25, %c0_26] : memref<1x1xf32, #tpu.memory_space<vmem>>, vector<1x1xf32>
      tpu.vector_store %arg4[%c0_25, %c0_26], %56 {strides = array<i32>} : memref<1x1xf32, #tpu.memory_space<vmem>>, vector<1x1xf32>,
    } else {
    }
    return
  }
  func.func @transform_0(%arg0: i32) -> (i32, i32) {
    %c0_i32 = arith.constant 0 : i32
    %c0_i32_0 = arith.constant 0 : i32
    return %c0_i32, %arg0 : i32, i32
  }
  func.func @transform_1(%arg0: i32) -> (i32, i32) {
    %c0_i32 = arith.constant 0 : i32
    %c0_i32_0 = arith.constant 0 : i32
    return %c0_i32, %arg0 : i32, i32
  }
  func.func @transform_2(%arg0: i32) -> (i32, i32) {
    %c0_i32 = arith.constant 0 : i32
    %c0_i32_0 = arith.constant 0 : i32
    %c0_i32_1 = arith.constant 0 : i32
    return %c0_i32, %c0_i32_0 : i32, i32
  }
  func.func @transform_3(%arg0: i32) -> (i32, i32) {
    %c0_i32 = arith.constant 0 : i32
    %c0_i32_0 = arith.constant 0 : i32
    %c0_i32_1 = arith.constant 0 : i32
    return %c0_i32, %c0_i32_0 : i32, i32
  }
}

</mosaic_0001>

<bundles_post_ra>
// kernel: tpu_custom_call.1
= control target key start
LH: loop header
LB: loop body
LE: loop exit
PB: predicated region body
PF: predicated region fallthrough
CT: control target
= control target key end

     0   :  { %8 = vsyncpa [#allocation4], 0  ;;  %s303_s0 = inlined_call_operand.vmem [shape: f32[10,128], index: 0, kind: input, shape index: {}]   ;;  %s304_s1 = inlined_call_operand.hbm [shape: f32[10,128], index: 1, kind: input, shape index: {}]   ;;  %s305_s2 = inlined_call_operand.vmem [shape: f32[10,1], index: 2, kind: input, shape index: {}]   ;;  %s306_s3 = inlined_call_operand.hbm [shape: f32[1,1], index: 3, kind: output, shape index: {}]  }
   0x1   :  { %9 = vsyncpa [#allocation5], 0  ;;  %s16_s14 = sshll.u32 %s304_s1, 4  ;;  %s251_s15 = smov [#allocation3]   ;;  %s17_s14 = int_to_ptr.hbm [resolvable:$true] %s16_s14 }
   0x2   :  { %s18_s16 = sshll.u32 %s251_s15, 4  ;;  %s252_s17 = smov 128   ;;  %s19_s16 = int_to_ptr.vmem [resolvable:$true] %s18_s16 }
   0x3   :  { %s253_s18 = smov 8  }
   0x4   :  { %24 = dma.hbm_to_vmem [thread:$0]  %s17_s14, 256, %s19_s16, [#allocation4], %s252_s17, %s252_s17, %s253_s18  }
   0x5   :  { %247 = dma.done.wait [#allocation4], 256  }
   0x6   :  { %248 = vsyncadd [#allocation4], 4294967040  ;;  %v254_v0 = vmov 0   ;;  %v41_v1 = vld [vmem:[%s305_s2 + $0x8] sm:$0x3]  ;;  %v40_v2 = vld [vmem:[%s305_s2] sm:$0xff]  ;;  %v93_v29 = vlaneseq }
   0x7   :  { %188 = vset.pattern.permute.xlu0 %v254_v0  ;;  %vm42_vm0 = vcmask 1041408   ;;  %v37_v3 = vld [vmem:[%s303_s0 + $0x8] sm:$0x3]  ;;  %v36_v4 = vld [vmem:[%s303_s0] sm:$0xff]  ;;  %v255_v54 = vmov 0.0   ;;  %vm150_vm9 = vcmask 1040384  }
   0x8   :  { %129 = vperm.xlu0 %188, %v41_v1   ;;  %v43_v5 = vsel %vm42_vm0, %v37_v3, -inf  ;;  %v39_v13 = vld [vmem:[#allocation3 + $0x8] sm:$0x3]  ;;  %v38_v14 = vld [vmem:[#allocation3] sm:$0xff]  ;;  %v94_v32 = vshrl.u32 %v93_v29, 7  ;;  %s257_s0 = smov [#allocation6]  }
   0x9   :  { %v44_v6 = vmax.f32 %v36_v4, %v43_v5  ;;  %v96_v16 = vsel %vm42_vm0, %v39_v13, -inf  ;;  %v67_v35 = vsel %vm42_vm0, %v39_v13, 0.0  ;;  %35 = vst [vmem:[#allocation2] sm:$0x1] %v255_v54  ;;  %s169_s2 = sshll.u32 %s257_s0, 4  ;;  %s171_s28 = sshll.u32 %s306_s3, 4  ;;  %s170_s2 = int_to_ptr.vmem [resolvable:$true] %s169_s2  ;;  %s172_s28 = int_to_ptr.hbm [resolvable:$true] %s171_s28 }
   0xa   :  { %v97_v18 = vmax.f32 %v38_v14, %v96_v16  ;;  %v95_v37 = vadd.s32 8, %v94_v32  ;;  %v68_v39 = vadd.f32 %v67_v35, %v38_v14  ;;  %vm162_vm11 = vcmask 0  }
   0xb   :  { %v45_v7 = vrot.slane %v44_v6, 4 }
   0xc   :  { %v98_v21 = vrot.slane %v97_v18, 4  ;;  %v69_v44 = vrot.slane %v68_v39, 4 }
   0xd   :  { %v46_v8 = vmax.f32 %v44_v6, %v45_v7 }
   0xe   :  { %v99_v22 = vmax.f32 %v97_v18, %v98_v21  ;;  %v70_v49 = vadd.f32 %v69_v44, %v68_v39 }
   0xf   :  { %v47_v9 = vrot.slane %v46_v8, 2 }
  0x10   :  { %124 = vperm.xlu0 %188, %v40_v2   ;;  %v100_v23 = vrot.slane %v99_v22, 2  ;;  %v71_v53 = vrot.slane %v70_v49, 2 }
  0x11   :  { %v48_v10 = vmax.f32 %v46_v8, %v47_v9 }
  0x12   :  { %v101_v25 = vmax.f32 %v99_v22, %v100_v23  ;;  %v72_v57 = vadd.f32 %v71_v53, %v70_v49 }
  0x13   :  { %v49_v11 = vrot.slane %v48_v10, 1 }
  0x14   :  { %v102_v30 = vrot.slane %v101_v25, 1  ;;  %v73_v59 = vrot.slane %v72_v57, 1 }
  0x15   :  { %v50_v12 = vmax.f32 %v48_v10, %v49_v11 }
  0x16   :  { %v103_v33 = vmax.f32 %v101_v25, %v102_v30  ;;  %v74_v1 = vadd.f32 %v73_v59, %v72_v57 }
  0x17   :  { %v52_v15 = vsub.f32 %v37_v3, %v50_v12  ;;  %v51_v17 = vsub.f32 %v36_v4, %v50_v12 }
  0x18   :  { %vm105_vm1 = vcmp.ge.f32.partialorder %v39_v13, %v103_v33  ;;  %vm104_vm2 = vcmp.ge.f32.partialorder %v38_v14, %v103_v33 }
  0x19   :  { %v55_v19 = vmul.f32 1.442695, %v52_v15  ;;  %v53_v20 = vmul.f32 1.442695, %v51_v17  ;;  %v76_v36 = vmul.f32 %v52_v15, %v39_v13  ;;  %v75_v40 = vmul.f32 %v51_v17, %v38_v14 }
  0x1a   :  { %v107_v42 = vsel %vm105_vm1, %v95_v37, 10  ;;  %v106_v46 = vsel %vm104_vm2, %v94_v32, 10 }
  0x1b   :  { %189 = vpow2.f32 %v55_v19  ;;  %v77_v41 = vsel %vm42_vm0, %v76_v36, 0.0  ;;  %v108_v47 = vsel %vm42_vm0, %v107_v42, 2147483647 }
  0x1c   :  { %191 = vpow2.f32 %v53_v20  ;;  %v78_v45 = vadd.f32 %v77_v41, %v75_v40  ;;  %vm109_vm3 = vcmp.lt.s32.totalorder %v106_v46, %v108_v47 }
  0x1d   :  { %v110_v51 = vsel %vm109_vm3, %v106_v46, %v108_v47 }
  0x1e   :  { %v79_v50 = vrot.slane %v78_v45, 4  ;;  %v111_v56 = vrot.slane %v110_v51, 4 }
  0x20   :  { %v80_v55 = vadd.f32 %v79_v50, %v78_v45  ;;  %vm112_vm4 = vcmp.lt.s32.totalorder %v110_v51, %v111_v56 }
  0x21   :  { %v190_v24 = vpop.eup %189  ;;  %v113_v62 = vsel %vm112_vm4, %v110_v51, %v111_v56 }
  0x22   :  { %v192_v26 = vpop.eup %191  ;;  %v57_v27 = vsel %vm42_vm0, %v190_v24, 0.0  ;;  %v81_v58 = vrot.slane %v80_v55, 2  ;;  %v114_v63 = vrot.slane %v113_v62, 2 }
  0x23   :  { %v58_v28 = vadd.f32 %v192_v26, %v57_v27  ;;  %v143_v27 = vld [vmem:[#allocation2] sm:$0x1] }
  0x24   :  { %v82_v60 = vadd.f32 %v81_v58, %v80_v55  ;;  %vm115_vm5 = vcmp.lt.s32.totalorder %v113_v62, %v114_v63 }
  0x25   :  { %v59_v31 = vrot.slane %v58_v28, 4  ;;  %v116_v5 = vsel %vm115_vm5, %v113_v62, %v114_v63 }
  0x26   :  { %v83_v2 = vrot.slane %v82_v60, 1  ;;  %v117_v7 = vrot.slane %v116_v5, 1 }
  0x27   :  { %v60_v34 = vadd.f32 %v59_v31, %v58_v28 }
  0x28   :  { %v84_v3 = vadd.f32 %v83_v2, %v82_v60  ;;  %vm118_vm6 = vcmp.lt.s32.totalorder %v116_v5, %v117_v7 }
  0x29   :  { %v61_v38 = vrot.slane %v60_v34, 2  ;;  %v119_v11 = vsel %vm118_vm6, %v116_v5, %v117_v7 }
  0x2a   :  { %vm121_vm7 = vcmp.eq.s32.totalorder %v95_v37, %v119_v11  ;;  %vm120_vm8 = vcmp.eq.s32.totalorder %v94_v32, %v119_v11  ;;  %v256_v32 = vmov 64.0  }
  0x2b   :  { %v62_v43 = vadd.f32 %v61_v38, %v60_v34 }
  0x2d   :  { %v63_v48 = vrot.slane %v62_v43, 1 }
  0x2f   :  { %v64_v52 = vadd.f32 %v63_v48, %v62_v43 }
  0x31   :  { %193 = vlog2.f32 %v64_v52 }
  0x37   :  { %v194_v61 = vpop.eup %193 }
  0x38   :  { %v66_v0 = vmul.f32 0.6931472, %v194_v61 }
  0x3a   :  { %v85_v4 = vmul.f32 %v74_v1, %v66_v0 }
  0x3c   :  { %v86_v6 = vsub.f32 %v85_v4, %v84_v3 }
  0x3e   :  { %v87_v8 = vsub.f32 0.0, %v86_v6 }
  0x40   :  { %v88_v9 = vmul.f32 1.442695, %v87_v8 }
  0x42   :  { %195 = vpow2.f32 %v88_v9 }
  0x43   :  { %197 = vrcp.f32 %v256_v32 }
  0x48   :  { %v196_v14 = vpop.eup %195 }
  0x49   :  { %v90_v18 = vsub.f32 1.0, %v196_v14  ;;  %v198_v33 = vpop.eup %197 }
  0x4a   :  { %v155_v34 = vmul.f32 64.0, %v198_v33  ;;  %vm159_vm10 = vweird.f32 %v198_v33 }
  0x4b   :  { %v91_v21 = vmul.f32 %v90_v18, %v90_v18 }
  0x4c   :  { %v156_v35 = vsub.f32 1.0, %v155_v34 }
  0x4d   :  { %v92_v24 = vmul.f32 %v91_v21, %v86_v6 }
  0x4e   :  { %v157_v36 = vmul.f32 %v198_v33, %v156_v35 }
  0x50   :  { %v158_v37 = vadd.f32 %v198_v33, %v157_v36 }
  0x52   :  { %v160_v38 = vsel %vm159_vm10, %v198_v33, %v158_v37 }
  0x7a   :  { %v130_v10 = vpop.permute.xlu0 %129 }
  0x7b   :  { %v133_v12 = vsel %vm121_vm7, %v130_v10, 0.0 }
  0x7c   :  { %v134_v15 = vsel %vm42_vm0, %v133_v12, 0.0 }
  0x82   :  { %v125_v13 = vpop.permute.xlu0 %124 }
  0x83   :  { %v132_v16 = vsel %vm120_vm8, %v125_v13, 0.0 }
  0x84   :  { %v135_v17 = vadd.f32 %v134_v15, %v132_v16 }
  0x86   :  { %v136_v19 = vrot.slane %v135_v17, 4 }
  0x88   :  { %v137_v20 = vadd.f32 %v136_v19, %v135_v17 }
  0x8a   :  { %v138_v22 = vrot.slane %v137_v20, 2 }
  0x8c   :  { %v139_v23 = vadd.f32 %v138_v22, %v137_v20 }
  0x8e   :  { %v140_v25 = vrot.slane %v139_v23, 1 }
  0x90   :  { %v141_v26 = vadd.f32 %v140_v25, %v139_v23 }
  0x92   :  { %v142_v28 = vmul.f32 %v141_v26, %v92_v24 }
  0x94   :  { %v144_v29 = vadd.f32 %v143_v27, %v142_v28 }
  0x96   :  { %145 = vst [vmem:[#allocation2] sm:$0x1] %v144_v29 }
  0x9d   :  { %v149_v30 = vld [vmem:[#allocation2] sm:$0x1] }
  0x9e   :  { %v151_v31 = vsel %vm150_vm9, %v149_v30, 0.0 }
  0x9f   :  { %152 = vadd.xlane.f32.xlu1 %v151_v31 }
 0x112   :  { %v153_v39 = vpop.xlane.xlu1 %152 }
 0x113   :  { %v161_v40 = vmul.f32 %v160_v38, %v153_v39 }
 0x115   :  { %163 = vst.msk [vmem:[#allocation6] sm:$0x1] %vm162_vm11, %v161_v40 }
 0x116   :  { %174 = dma.vmem_to_hbm [thread:$0]  %s170_s2, 16, %s172_s28, [#allocation5]  }
 0x117   :  { %249 = dma.done.wait [#allocation5], 16  }
 0x118   :  { %250 = vsyncadd [#allocation5], 4294967280 }
 0x119   :  { %179 = vsyncpa [#allocation4], 1 }
 0x11a   :  { %180 = vsyncpa [#allocation5], 1 }

</bundles_post_ra>
